<compile_context>
chip_gen: v5e
topology: v5e:2x2
jax: 0.10.0
libtpu: 0.0.40
codegen_flags: <defaults>
</compile_context>

<pallas_src>
import jax
import jax.numpy as jnp
from jax import lax
from jax.experimental import pallas as pl
from jax.experimental.pallas import tpu as pltpu


# Network config implied by the PyTorch module (input_n = X_train.shape[-1]).
INPUT_N = 32                       # stand-in for X_train.shape[-1]
LAYER_DIMS = [INPUT_N, 64, 64, 64, 32, 16, 2]
NUM_LAYERS = len(LAYER_DIMS) - 1   # 6 linear layers
MAX_DIM = 64                       # max(in, out) over all layers
OUT_DIM = LAYER_DIMS[-1]
LANE_STRIDE = 128                  # lane offset between layers in the packed weight slab
W_LANES = NUM_LAYERS * LANE_STRIDE # 768, multiple of 128 -> lane-dense weight DMA


def _round_up(x, m):
    return ((x + m - 1) // m) * m


def _choose_tile(batch, block_batch):
    """Lane-aligned batch tile: as large as block_batch, but keep >= 4 grid
    steps when the batch is big enough (pipeline overlap + v7x megacore)."""
    padded128 = _round_up(batch, 128)
    tb = min(_round_up(block_batch, 128), padded128)
    min_steps = 4
    if padded128 >= min_steps * 128:
        cap = max(128, (padded128 // min_steps) // 128 * 128)
        tb = min(tb, cap)
    return tb


def fc_net_kernel(x_ref, w_ref, b_ref, out_ref):
    """Fused MLP forward on one batch tile.

    x_ref   : [TB, INPUT_N]                 bf16  (batch-major contiguous row block)
    w_ref   : [MAX_DIM, NUM_LAYERS*128]     bf16  (lane-dense packed [out, in] weights)
    b_ref   : [NUM_LAYERS, MAX_DIM, 1]      f32   (bias column vectors)
    out_ref : [OUT_DIM, TB]                 f32   (softmax probs, lane-dense store)
    """
    # ---- Layer 0: fold the [TB, in] -> [in, TB] transpose into the matmul by
    # contracting W dim 1 (in) with x dim 1 (in); the result is already [out, TB].
    w0 = w_ref[:LAYER_DIMS[1], 0:LAYER_DIMS[0]]                 # [64, INPUT_N] bf16
    h = lax.dot_general(w0, x_ref[...],
                        dimension_numbers=(((1,), (1,)), ((), ())),
                        preferred_element_type=jnp.float32)     # [64, TB] f32
    h = jnp.maximum(h + b_ref[0, :LAYER_DIMS[1], :], 0.0)

    # ---- Remaining layers: bf16 MXU matmuls, f32 bias/ReLU (VPU stays f32).
    for li in range(1, NUM_LAYERS):
        in_d = LAYER_DIMS[li]
        out_d = LAYER_DIMS[li + 1]
        w = w_ref[:out_d, li * LANE_STRIDE: li * LANE_STRIDE + in_d]  # [out, in] bf16
        b = b_ref[li, :out_d, :]                                      # [out, 1]  f32
        h = jnp.dot(w, h.astype(jnp.bfloat16),
                    preferred_element_type=jnp.float32) + b
        h = jnp.maximum(h, 0.0)                                       # ReLU (incl. last layer)

    # ---- Softmax over the feature axis (PyTorch dim=1 == axis 0 here), per column.
    m = jnp.max(h, axis=0, keepdims=True)                             # [1, TB]
    e = jnp.exp(h - m)                                                # [OUT_DIM, TB]
    denom = jnp.sum(e, axis=0, keepdims=True)                         # [1, TB]
    out_ref[...] = (e * pl.reciprocal(denom)).astype(out_ref.dtype)   # exact reciprocal


def pack_params(params):
    """params: list of (W [out,in] f32, b [out] f32) in PyTorch layout.

    Weights go into one lane-dense [MAX_DIM, NUM_LAYERS*128] bf16 slab (each
    layer at a 128-aligned lane offset); biases into [NUM_LAYERS, MAX_DIM, 1] f32.
    Both use constant index_maps -> fetched once, VMEM-resident across the grid."""
    w_pack = jnp.zeros((MAX_DIM, W_LANES), jnp.bfloat16)
    b_pack = jnp.zeros((NUM_LAYERS, MAX_DIM, 1), jnp.float32)
    for li, (w, b) in enumerate(params):
        o, i = w.shape
        w_pack = w_pack.at[:o, li * LANE_STRIDE: li * LANE_STRIDE + i].set(
            w.astype(jnp.bfloat16))
        b_pack = b_pack.at[li, :o, 0].set(b)
    return w_pack, b_pack


def fc_net_forward(x, w_pack, b_pack, *, block_batch=8192):
    """x: [batch, INPUT_N] f32 -> [batch, OUT_DIM] f32 softmax probabilities."""
    batch = x.shape[0]
    tb = _choose_tile(batch, block_batch)
    padded = _round_up(batch, tb)

    # bf16 input: matmul operands are bf16 anyway; halves input HBM bytes.
    x_bf16 = x.astype(jnp.bfloat16)
    if padded != batch:                       # only pads when batch % tb != 0
        x_bf16 = jnp.pad(x_bf16, ((0, padded - batch), (0, 0)))

    grid = padded // tb
    flops = 2 * sum(LAYER_DIMS[i] * LAYER_DIMS[i + 1]
                    for i in range(NUM_LAYERS)) * padded
    bytes_accessed = (x_bf16.size * 2 + OUT_DIM * padded * 4
                      + w_pack.size * 2 + b_pack.size * 4)

    out_t = pl.pallas_call(
        fc_net_kernel,
        out_shape=jax.ShapeDtypeStruct((OUT_DIM, padded), jnp.float32),
        grid_spec=pltpu.PrefetchScalarGridSpec(
            num_scalar_prefetch=0,
            grid=(grid,),
            in_specs=[
                # Batch-major contiguous row block of the input.
                pl.BlockSpec((tb, INPUT_N), lambda i: (i, 0)),
                # Weights / biases: constant index_map -> fetched once, resident.
                pl.BlockSpec((MAX_DIM, W_LANES), lambda i: (0, 0)),
                pl.BlockSpec((NUM_LAYERS, MAX_DIM, 1), lambda i: (0, 0, 0)),
            ],
            out_specs=pl.BlockSpec((OUT_DIM, tb), lambda i: (0, i)),
        ),
        compiler_params=pltpu.CompilerParams(
            dimension_semantics=("parallel",),   # batch axis splits across v7x's 2 TCs
            vmem_limit_bytes=32 * 1024 * 1024,   # usage << limit on v5e/v6e/v7x
        ),
        cost_estimate=pl.CostEstimate(
            flops=flops,
            transcendentals=(OUT_DIM + 1) * padded,   # exp + reciprocal
            bytes_accessed=bytes_accessed,
        ),
    )(x_bf16, w_pack, b_pack)

    # Output is tiny (8 B/sample); transposing it back to batch-major is cheap.
    return jnp.transpose(out_t)[:batch]


def init_params(key):
    """Deterministic PyTorch-style init: U(-1/sqrt(fan_in), 1/sqrt(fan_in))."""
    params = []
    for li in range(NUM_LAYERS):
        fan_in = LAYER_DIMS[li]
        fan_out = LAYER_DIMS[li + 1]
        key, kw, kb = jax.random.split(key, 3)
        bound = 1.0 / jnp.sqrt(float(fan_in))
        w_pt = jax.random.uniform(kw, (fan_out, fan_in), jnp.float32, -bound, bound)
        b_pt = jax.random.uniform(kb, (fan_out,), jnp.float32, -bound, bound)
        params.append((w_pt, b_pt))
    return params


def reference_forward(x, params):
    """Plain-JAX reference with matching bf16 matmul semantics."""
    h = x
    for w, b in params:
        h = jnp.dot(h.astype(jnp.bfloat16), w.astype(jnp.bfloat16).T,
                    preferred_element_type=jnp.float32) + b
        h = jnp.maximum(h, 0.0)              # ReLU after every Linear (incl. last)
    return jax.nn.softmax(h, axis=1)


if __name__ == "__main__":
    key = jax.random.PRNGKey(0)
    key, kx = jax.random.split(key)
    batch = 8
    x = jax.random.normal(kx, (batch, INPUT_N), jnp.float32)

    params = init_params(key)
    w_pack, b_pack = pack_params(params)

    out = fc_net_forward(x, w_pack, b_pack)
    out = jax.block_until_ready(out)

    ref = reference_forward(x, params)
    assert out.shape == (batch, OUT_DIM)
    # bf16 matmul operands -> relaxed tolerance vs f32-ish reference path.
    assert jnp.allclose(out, ref, atol=5e-3, rtol=5e-3), "mismatch vs JAX reference"
    # Exact reciprocal: softmax rows sum to 1.
    assert jnp.allclose(jnp.sum(out, axis=1), jnp.ones((batch,)), atol=1e-4)

    print("KERNEL_OK")
</pallas_src>

<mosaic_0001>
module attributes {stable_mosaic.version = 11 : i64} {
  func.func @fc_net_kernel(%arg0: i32, %arg1: memref<128x32xbf16, #tpu.memory_space<vmem>>, %arg2: memref<64x768xbf16, #tpu.memory_space<vmem>>, %arg3: memref<6x64x1xf32, #tpu.memory_space<vmem>>, %arg4: memref<2x128xf32, #tpu.memory_space<vmem>>) attributes {dimension_semantics = [#tpu.dimension_semantics<parallel>], iteration_bounds = array<i64: 1>, scalar_prefetch = 0 : i64, scratch_operands = 0 : i64, tpu.core_type = #tpu.core_type<tc>, window_params = [{transform_indices = @transform_0, window_bounds = array<i64: 128, 32>}, {pipeline_mode = #tpu.pipeline_mode<synchronous>, transform_indices = @transform_1, window_bounds = array<i64: 64, 768>}, {pipeline_mode = #tpu.pipeline_mode<synchronous>, transform_indices = @transform_2, window_bounds = array<i64: 6, 64, 1>}, {transform_indices = @transform_3, window_bounds = array<i64: 2, 128>}]} {
    %c0 = arith.constant 0 : index
    %c0_0 = arith.constant 0 : index
    %0 = vector.load %arg2[%c0, %c0_0] : memref<64x768xbf16, #tpu.memory_space<vmem>>, vector<64x32xbf16>
    %c0_1 = arith.constant 0 : index
    %c0_2 = arith.constant 0 : index
    %1 = vector.load %arg1[%c0_1, %c0_2] : memref<128x32xbf16, #tpu.memory_space<vmem>>, vector<128x32xbf16>
    %cst = arith.constant dense<0.000000e+00> : vector<64x128xf32>
    %2 = tpu.matmul %0, %1, %cst {dimension_numbers = #tpu.dot_dimension_numbers<[1], [1], [0], [0], [0, 0, 1, 0], [], []>} : vector<64x32xbf16>, vector<128x32xbf16>, vector<64x128xf32> -> vector<64x128xf32>
    %c0_3 = arith.constant 0 : index
    %c0_4 = arith.constant 0 : index
    %c0_5 = arith.constant 0 : index
    %3 = vector.load %arg3[%c0_3, %c0_4, %c0_5] : memref<6x64x1xf32, #tpu.memory_space<vmem>>, vector<1x64x1xf32>
    %4 = vector.shape_cast %3 : vector<1x64x1xf32> to vector<64x1xf32>
    %5 = vector.broadcast %4 : vector<64x1xf32> to vector<64x128xf32>
    %6 = arith.addf %2, %5 : vector<64x128xf32>
    %cst_6 = arith.constant 0.000000e+00 : f32
    %7 = vector.broadcast %cst_6 : f32 to vector<64x128xf32>
    %8 = arith.maximumf %6, %7 : vector<64x128xf32>
    %c0_7 = arith.constant 0 : index
    %c128 = arith.constant 128 : index
    %9 = vector.load %arg2[%c0_7, %c128] : memref<64x768xbf16, #tpu.memory_space<vmem>>, vector<64x64xbf16>
    %c1 = arith.constant 1 : index
    %c0_8 = arith.constant 0 : index
    %c0_9 = arith.constant 0 : index
    %10 = vector.load %arg3[%c1, %c0_8, %c0_9] : memref<6x64x1xf32, #tpu.memory_space<vmem>>, vector<1x64x1xf32>
    %11 = vector.shape_cast %10 : vector<1x64x1xf32> to vector<64x1xf32>
    %12 = arith.truncf %8 : vector<64x128xf32> to vector<64x128xbf16>
    %cst_10 = arith.constant dense<0.000000e+00> : vector<64x128xf32>
    %13 = tpu.matmul %9, %12, %cst_10 {dimension_numbers = #tpu.dot_dimension_numbers<[1], [0], [0], [1], [0, 0, 1, 1], [], []>} : vector<64x64xbf16>, vector<64x128xbf16>, vector<64x128xf32> -> vector<64x128xf32>
    %14 = vector.broadcast %11 : vector<64x1xf32> to vector<64x128xf32>
    %15 = arith.addf %13, %14 : vector<64x128xf32>
    %cst_11 = arith.constant 0.000000e+00 : f32
    %16 = vector.broadcast %cst_11 : f32 to vector<64x128xf32>
    %17 = arith.maximumf %15, %16 : vector<64x128xf32>
    %c0_12 = arith.constant 0 : index
    %c256 = arith.constant 256 : index
    %18 = vector.load %arg2[%c0_12, %c256] : memref<64x768xbf16, #tpu.memory_space<vmem>>, vector<64x64xbf16>
    %c2 = arith.constant 2 : index
    %c0_13 = arith.constant 0 : index
    %c0_14 = arith.constant 0 : index
    %19 = vector.load %arg3[%c2, %c0_13, %c0_14] : memref<6x64x1xf32, #tpu.memory_space<vmem>>, vector<1x64x1xf32>
    %20 = vector.shape_cast %19 : vector<1x64x1xf32> to vector<64x1xf32>
    %21 = arith.truncf %17 : vector<64x128xf32> to vector<64x128xbf16>
    %cst_15 = arith.constant dense<0.000000e+00> : vector<64x128xf32>
    %22 = tpu.matmul %18, %21, %cst_15 {dimension_numbers = #tpu.dot_dimension_numbers<[1], [0], [0], [1], [0, 0, 1, 1], [], []>} : vector<64x64xbf16>, vector<64x128xbf16>, vector<64x128xf32> -> vector<64x128xf32>
    %23 = vector.broadcast %20 : vector<64x1xf32> to vector<64x128xf32>
    %24 = arith.addf %22, %23 : vector<64x128xf32>
    %cst_16 = arith.constant 0.000000e+00 : f32
    %25 = vector.broadcast %cst_16 : f32 to vector<64x128xf32>
    %26 = arith.maximumf %24, %25 : vector<64x128xf32>
    %c0_17 = arith.constant 0 : index
    %c384 = arith.constant 384 : index
    %27 = vector.load %arg2[%c0_17, %c384] : memref<64x768xbf16, #tpu.memory_space<vmem>>, vector<32x64xbf16>
    %c3 = arith.constant 3 : index
    %c0_18 = arith.constant 0 : index
    %c0_19 = arith.constant 0 : index
    %28 = vector.load %arg3[%c3, %c0_18, %c0_19] : memref<6x64x1xf32, #tpu.memory_space<vmem>>, vector<1x32x1xf32>
    %29 = vector.shape_cast %28 : vector<1x32x1xf32> to vector<32x1xf32>
    %30 = arith.truncf %26 : vector<64x128xf32> to vector<64x128xbf16>
    %cst_20 = arith.constant dense<0.000000e+00> : vector<32x128xf32>
    %31 = tpu.matmul %27, %30, %cst_20 {dimension_numbers = #tpu.dot_dimension_numbers<[1], [0], [0], [1], [0, 0, 1, 1], [], []>} : vector<32x64xbf16>, vector<64x128xbf16>, vector<32x128xf32> -> vector<32x128xf32>
    %32 = vector.broadcast %29 : vector<32x1xf32> to vector<32x128xf32>
    %33 = arith.addf %31, %32 : vector<32x128xf32>
    %cst_21 = arith.constant 0.000000e+00 : f32
    %34 = vector.broadcast %cst_21 : f32 to vector<32x128xf32>
    %35 = arith.maximumf %33, %34 : vector<32x128xf32>
    %c0_22 = arith.constant 0 : index
    %c512 = arith.constant 512 : index
    %36 = vector.load %arg2[%c0_22, %c512] : memref<64x768xbf16, #tpu.memory_space<vmem>>, vector<16x32xbf16>
    %c4 = arith.constant 4 : index
    %c0_23 = arith.constant 0 : index
    %c0_24 = arith.constant 0 : index
    %37 = vector.load %arg3[%c4, %c0_23, %c0_24] : memref<6x64x1xf32, #tpu.memory_space<vmem>>, vector<1x16x1xf32>
    %38 = vector.shape_cast %37 : vector<1x16x1xf32> to vector<16x1xf32>
    %39 = arith.truncf %35 : vector<32x128xf32> to vector<32x128xbf16>
    %cst_25 = arith.constant dense<0.000000e+00> : vector<16x128xf32>
    %40 = tpu.matmul %36, %39, %cst_25 {dimension_numbers = #tpu.dot_dimension_numbers<[1], [0], [0], [1], [0, 0, 1, 1], [], []>} : vector<16x32xbf16>, vector<32x128xbf16>, vector<16x128xf32> -> vector<16x128xf32>
    %41 = vector.broadcast %38 : vector<16x1xf32> to vector<16x128xf32>
    %42 = arith.addf %40, %41 : vector<16x128xf32>
    %cst_26 = arith.constant 0.000000e+00 : f32
    %43 = vector.broadcast %cst_26 : f32 to vector<16x128xf32>
    %44 = arith.maximumf %42, %43 : vector<16x128xf32>
    %c0_27 = arith.constant 0 : index
    %c640 = arith.constant 640 : index
    %45 = vector.load %arg2[%c0_27, %c640] : memref<64x768xbf16, #tpu.memory_space<vmem>>, vector<2x16xbf16>
    %c5 = arith.constant 5 : index
    %c0_28 = arith.constant 0 : index
    %c0_29 = arith.constant 0 : index
    %46 = vector.load %arg3[%c5, %c0_28, %c0_29] : memref<6x64x1xf32, #tpu.memory_space<vmem>>, vector<1x2x1xf32>
    %47 = vector.shape_cast %46 : vector<1x2x1xf32> to vector<2x1xf32>
    %48 = arith.truncf %44 : vector<16x128xf32> to vector<16x128xbf16>
    %cst_30 = arith.constant dense<0.000000e+00> : vector<2x128xf32>
    %49 = tpu.matmul %45, %48, %cst_30 {dimension_numbers = #tpu.dot_dimension_numbers<[1], [0], [0], [1], [0, 0, 1, 1], [], []>} : vector<2x16xbf16>, vector<16x128xbf16>, vector<2x128xf32> -> vector<2x128xf32>
    %50 = vector.broadcast %47 : vector<2x1xf32> to vector<2x128xf32>
    %51 = arith.addf %49, %50 : vector<2x128xf32>
    %cst_31 = arith.constant 0.000000e+00 : f32
    %52 = vector.broadcast %cst_31 : f32 to vector<2x128xf32>
    %53 = arith.maximumf %51, %52 : vector<2x128xf32>
    %cst_32 = arith.constant dense<0xFF800000> : vector<128xf32>
    %54 = vector.multi_reduction <maximumf>, %53, %cst_32 [0] : vector<2x128xf32> to vector<128xf32>
    %55 = vector.shape_cast %54 : vector<128xf32> to vector<1x128xf32>
    %56 = vector.broadcast %55 : vector<1x128xf32> to vector<2x128xf32>
    %57 = arith.subf %53, %56 : vector<2x128xf32>
    %58 = math.exp %57 : vector<2x128xf32>
    %cst_33 = arith.constant dense<0.000000e+00> : vector<128xf32>
    %59 = vector.multi_reduction <add>, %58, %cst_33 [0] : vector<2x128xf32> to vector<128xf32>
    %60 = vector.shape_cast %59 : vector<128xf32> to vector<1x128xf32>
    %61 = tpu.reciprocal %60 : vector<1x128xf32> -> vector<1x128xf32>
    %62 = vector.broadcast %61 : vector<1x128xf32> to vector<2x128xf32>
    %63 = arith.mulf %58, %62 : vector<2x128xf32>
    %c0_34 = arith.constant 0 : index
    %c0_35 = arith.constant 0 : index
    %64 = vector.load %arg4[%c0_34, %c0_35] : memref<2x128xf32, #tpu.memory_space<vmem>>, vector<2x128xf32>
    tpu.vector_store %arg4[%c0_34, %c0_35], %63 {strides = array<i32>} : memref<2x128xf32, #tpu.memory_space<vmem>>, vector<2x128xf32>,
    return
  }
  func.func @transform_0(%arg0: i32) -> (i32, i32) {
    %c0_i32 = arith.constant 0 : i32
    %c0_i32_0 = arith.constant 0 : i32
    return %arg0, %c0_i32 : i32, i32
  }
  func.func @transform_1(%arg0: i32) -> (i32, i32) {
    %c0_i32 = arith.constant 0 : i32
    %c0_i32_0 = arith.constant 0 : i32
    %c0_i32_1 = arith.constant 0 : i32
    return %c0_i32, %c0_i32_0 : i32, i32
  }
  func.func @transform_2(%arg0: i32) -> (i32, i32, i32) {
    %c0_i32 = arith.constant 0 : i32
    %c0_i32_0 = arith.constant 0 : i32
    %c0_i32_1 = arith.constant 0 : i32
    %c0_i32_2 = arith.constant 0 : i32
    return %c0_i32, %c0_i32_0, %c0_i32_1 : i32, i32, i32
  }
  func.func @transform_3(%arg0: i32) -> (i32, i32) {
    %c0_i32 = arith.constant 0 : i32
    %c0_i32_0 = arith.constant 0 : i32
    return %c0_i32, %arg0 : i32, i32
  }
}

</mosaic_0001>

<bundles_post_ra>
// kernel: tpu_custom_call.1
= control target key start
LH: loop header
LB: loop body
LE: loop exit
PB: predicated region body
PF: predicated region fallthrough
CT: control target
= control target key end

     0   :  { %vm148_vm0 = vcmask 261120   ;;  %s1120_s0 = inlined_call_operand.vmem [shape: bf16[128,32], index: 0, kind: input, shape index: {}]   ;;  %s1121_s1 = inlined_call_operand.vmem [shape: bf16[64,768], index: 1, kind: input, shape index: {}]   ;;  %s1122_s2 = inlined_call_operand.vmem [shape: f32[6,64,1], index: 2, kind: input, shape index: {}]   ;;  %s1123_s3 = inlined_call_operand.hbm [shape: f32[2,128], index: 3, kind: output, shape index: {}]  }
   0x1   :  { %v815_v0 = vld [vmem:[%s1120_s0 + $0x38] sm:$0xff] }
   0x2   :  { %8 = vsyncpa [#allocation3], 0  ;;  %v183_v1 = vsel %vm148_vm0, %v815_v0, 0  ;;  %v814_v2 = vld [vmem:[%s1120_s0 + $0x30] sm:$0xff]  ;;  %v813_v5 = vld [vmem:[%s1120_s0 + $0x28] sm:$0xff]  ;;  %v862_v6 = vmov 0  }
   0x3   :  { %185 = vmatpush.bf16.xpose.msra.mxu0 %v183_v1  ;;  %v180_v3 = vsel %vm148_vm0, %v814_v2, 0  ;;  %v46_v4 = vld [vmem:[%s1122_s2 + $0x30] sm:$0xff]  ;;  %829 = vset.pattern.permute.xlu0 %v862_v6  ;;  %v177_v7 = vsel %vm148_vm0, %v813_v5, 0  ;;  %v47_v8 = vld [vmem:[%s1122_s2 + $0x38] sm:$0xff]  ;;  %v44_v9 = vld [vmem:[%s1122_s2 + $0x20] sm:$0xff]  ;;  %vm303_vm1 = vcmask 523264  }
   0x4   :  { %830 = vset.pattern.permute.xlu1 %v862_v6  ;;  %80 = vperm.xlu0 %829, %v46_v4   ;;  %v812_v10 = vld [vmem:[%s1120_s0 + $0x20] sm:$0xff]  ;;  %v45_v13 = vld [vmem:[%s1122_s2 + $0x28] sm:$0xff]  ;;  %v811_v14 = vld [vmem:[%s1120_s0 + $0x18] sm:$0xff]  ;;  %vm605_vm2 = vcmask 130048   ;;  %vm623_vm3 = vcmask 1041408   ;;  %s664_s14 = sshll.u32 %s1123_s3, 4  ;;  %s665_s14 = int_to_ptr.hbm [resolvable:$true] %s664_s14 }
   0x5   :  { %831 = vset.pattern.permute.xlu2 %v862_v6  ;;  %70 = vperm.xlu1 %830, %v44_v9   ;;  %v174_v11 = vsel %vm148_vm0, %v812_v10, 0  ;;  %v40_v12 = vld [vmem:[%s1122_s2] sm:$0xff]  ;;  %v171_v15 = vsel %vm148_vm0, %v811_v14, 0  ;;  %v732_v16 = vld [vmem:[%s1122_s2 + $0x78] sm:$0xff]  ;;  %v41_v17 = vld [vmem:[%s1122_s2 + $0x8] sm:$0xff] }
   0x6   :  { %v810_v18 = vld [vmem:[%s1120_s0 + $0x10] sm:$0xff]  ;;  %v729_v20 = vld [vmem:[%s1122_s2 + $0x60] sm:$0xff]  ;;  %v809_v22 = vld [vmem:[%s1120_s0 + $0x8] sm:$0xff] }
   0x7   :  { %v168_v19 = vsel %vm148_vm0, %v810_v18, 0  ;;  %v727_v21 = vld [vmem:[%s1122_s2 + $0x50] sm:$0xff]  ;;  %v165_v23 = vsel %vm148_vm0, %v809_v22, 0  ;;  %v726_v25 = vld [vmem:[%s1122_s2 + $0x48] sm:$0xff]  ;;  %v728_v26 = vld [vmem:[%s1122_s2 + $0x58] sm:$0xff] }
   0x8   :  { %v42_v24 = vld [vmem:[%s1122_s2 + $0x10] sm:$0xff]  ;;  %v808_v27 = vld [vmem:[%s1120_s0] sm:$0xff]  ;;  %v43_v29 = vld [vmem:[%s1122_s2 + $0x18] sm:$0xff] }
   0x9   :  { %60 = vperm.xlu2 %831, %v42_v24   ;;  %v162_v28 = vsel %vm148_vm0, %v808_v27, 0  ;;  %v759_v30 = vld [vmem:[%s1122_s2 + $0xb0] sm:$0xff]  ;;  %v757_v31 = vld [vmem:[%s1122_s2 + $0xa0] sm:$0xff]  ;;  %v804_v33 = vld [vmem:[%s1121_s1 + $0x14] sm:$0xf0] }
   0xa   :  { %v675_v32 = vld [vmem:[%s1121_s1] sm:$0xf]  ;;  %v731_v35 = vld [vmem:[%s1122_s2 + $0x70] sm:$0xff]  ;;  %v756_v36 = vld [vmem:[%s1122_s2 + $0x98] sm:$0xff] }
   0xb   :  { %186 = vmatpush.bf16.xpose.msra.mxu0 %v180_v3  ;;  %v676_v34 = vor.u32 %v804_v33, %v675_v32  ;;  %v758_v37 = vld [vmem:[%s1122_s2 + $0xa8] sm:$0xff]  ;;  %v753_v39 = vld [vmem:[%s1122_s2 + $0x80] sm:$0xff]  ;;  %v783_v40 = vld [vmem:[%s1122_s2 + $0xd0] sm:$0xff] }
   0xc   :  { %85 = vperm.xlu0 %829, %v47_v8   ;;  %v730_v38 = vld [vmem:[%s1122_s2 + $0x68] sm:$0xff]  ;;  %v679_v41 = vld [vmem:[%s1121_s1 + $0x30] sm:$0xf]  ;;  %v725_v44 = vld [vmem:[%s1122_s2 + $0x40] sm:$0xff] }
   0xd   :  { %75 = vperm.xlu1 %830, %v45_v13   ;;  %v805_v42 = vld [vmem:[%s1121_s1 + $0x44] sm:$0xf0]  ;;  %v784_v46 = vld [vmem:[%s1122_s2 + $0xd8] sm:$0xff]  ;;  %v795_v48 = vld [vmem:[%s1122_s2 + $0x100] sm:$0xff] }
   0xe   :  { %v680_v43 = vor.u32 %v805_v42, %v679_v41  ;;  %v782_v45 = vld [vmem:[%s1122_s2 + $0xc8] sm:$0xff]  ;;  %v760_v47 = vld [vmem:[%s1122_s2 + $0xb8] sm:$0xff]  ;;  %v802_v49 = vld [vmem:[%s1122_s2 + $0x140] sm:$0x3] }
   0xf   :  { %v683_v50 = vld [vmem:[%s1121_s1 + $0x60] sm:$0xf]  ;;  %v806_v51 = vld [vmem:[%s1121_s1 + $0x74] sm:$0xf0]  ;;  %v755_v53 = vld [vmem:[%s1122_s2 + $0x90] sm:$0xff] }
  0x10   :  { %v684_v52 = vor.u32 %v806_v51, %v683_v50  ;;  %v754_v54 = vld [vmem:[%s1122_s2 + $0x88] sm:$0xff]  ;;  %v687_v55 = vld [vmem:[%s1121_s1 + $0x90] sm:$0xf]  ;;  %v781_v58 = vld [vmem:[%s1122_s2 + $0xc0] sm:$0xff] }
  0x11   :  { %65 = vperm.xlu2 %831, %v43_v29   ;;  %v807_v56 = vld [vmem:[%s1121_s1 + $0xa4] sm:$0xf0]  ;;  %v816_v32 = vld [vmem:[%s1121_s1 + $0x18] sm:$0xf0]  ;;  %v747_v41 = vld [vmem:[%s1121_s1 + $0x94] sm:$0xf] }
  0x12   :  { %v688_v57 = vor.u32 %v807_v56, %v687_v55  ;;  %v796_v59 = vld [vmem:[%s1122_s2 + $0x108] sm:$0xff] }
  0x13   :  { %187 = vmatpush.bf16.xpose.msra.mxu0 %v177_v7  ;;  %v819_v42 = vld [vmem:[%s1121_s1 + $0xa8] sm:$0xf0] }
  0x14   :  { %50 = vperm.xlu0 %829, %v40_v12  }
  0x15   :  { %55 = vperm.xlu1 %830, %v41_v17  }
  0x19   :  { %275 = vperm.xlu2 %831, %v731_v35   ;;  %v739_v35 = vld [vmem:[%s1121_s1 + $0x34] sm:$0xf] }
  0x1b   :  { %188 = vmatpush.bf16.xpose.msra.mxu0 %v174_v11 }
  0x1c   :  { %280 = vperm.xlu0 %829, %v732_v16  }
  0x1d   :  { %265 = vperm.xlu1 %830, %v729_v20  }
  0x21   :  { %270 = vperm.xlu2 %831, %v730_v38   ;;  %v743_v38 = vld [vmem:[%s1121_s1 + $0x64] sm:$0xf] }
  0x23   :  { %189 = vmatpush.bf16.xpose.msra.mxu0 %v171_v15 }
  0x24   :  { %255 = vperm.xlu0 %829, %v727_v21  }
  0x25   :  { %260 = vperm.xlu1 %830, %v728_v26  }
  0x29   :  { %245 = vperm.xlu2 %831, %v725_v44  }
  0x2b   :  { %190 = vmatpush.bf16.xpose.msra.mxu0 %v168_v19 }
  0x2c   :  { %250 = vperm.xlu0 %829, %v726_v25  }
  0x2d   :  { %406 = vperm.xlu1 %830, %v759_v30  }
  0x31   :  { %411 = vperm.xlu2 %831, %v760_v47  }
  0x33   :  { %191 = vmatpush.bf16.xpose.msra.mxu0 %v165_v23 }
  0x34   :  { %396 = vperm.xlu0 %829, %v757_v31   ;;  %v735_v31 = vld [vmem:[%s1121_s1 + $0x4] sm:$0xf] }
  0x35   :  { %401 = vperm.xlu1 %830, %v758_v37  }
  0x39   :  { %386 = vperm.xlu2 %831, %v755_v53  }
  0x3b   :  { %192 = vmatpush.bf16.xpose.msra.mxu0 %v162_v28 }
  0x3c   :  { %391 = vperm.xlu0 %829, %v756_v36   ;;  %v817_v36 = vld [vmem:[%s1121_s1 + $0x48] sm:$0xf0] }
  0x3d   :  { %376 = vperm.xlu1 %830, %v753_v39   ;;  %v740_v37 = vor.u32 %v817_v36, %v739_v35  ;;  %v818_v39 = vld [vmem:[%s1121_s1 + $0x78] sm:$0xf0] }
  0x41   :  { %381 = vperm.xlu2 %831, %v754_v54  }
  0x42   :  { %721 = vmatmul.msk.bf16.vlgmr.msra.gmra.mxu0 %vm148_vm0, %v676_v34  ;;  %v736_v34 = vor.u32 %v816_v32, %v735_v31 }
  0x44   :  { %508 = vperm.xlu0 %829, %v783_v40   ;;  %v744_v40 = vor.u32 %v818_v39, %v743_v38 }
  0x45   :  { %513 = vperm.xlu1 %830, %v784_v46  }
  0x49   :  { %498 = vperm.xlu2 %831, %v781_v58  }
  0x4c   :  { %503 = vperm.xlu0 %829, %v782_v45  }
  0x4d   :  { %564 = vperm.xlu1 %830, %v795_v48  }
  0x51   :  { %569 = vperm.xlu2 %831, %v796_v59  }
  0x52   :  { %722 = vmatmul.msk.bf16.gmra.mxu0 %vm148_vm0, %v680_v43  ;;  %v748_v43 = vor.u32 %v819_v42, %v747_v41 }
  0x54   :  { %602 = vperm.xlu0 %829, %v802_v49  }
  0x62   :  { %723 = vmatmul.msk.bf16.gmra.mxu0 %vm148_vm0, %v684_v52 }
  0x63   :  { %v61_v5 = vpop.permute.xlu2 %60 }
  0x6b   :  { %v66_v15 = vpop.permute.xlu2 %65 }
  0x72   :  { %724 = vmatmul.msk.bf16.gmra.mxu0 %vm148_vm0, %v688_v57 }
  0x73   :  { %v276_v51 = vpop.permute.xlu2 %275 }
  0x76   :  { %v81_v3 = vpop.permute.xlu0 %80 }
  0x77   :  { %v71_v2 = vpop.permute.xlu1 %70 }
  0x7b   :  { %v271_v56 = vpop.permute.xlu2 %270 }
  0x7e   :  { %v86_v8 = vpop.permute.xlu0 %85 }
  0x7f   :  { %v76_v6 = vpop.permute.xlu1 %75 }
  0x86   :  { %v51_v25 = vpop.permute.xlu0 %50 }
  0x87   :  { %v56_v21 = vpop.permute.xlu1 %55 }
  0x8e   :  { %v281_v50 = vpop.permute.xlu0 %280 }
  0x8f   :  { %v266_v53 = vpop.permute.xlu1 %265 }
  0x96   :  { %v256_v54 = vpop.permute.xlu0 %255 }
  0xbf   :  { %v194_v60 = vpop.f32.mrf.mxu0 }
  0xc0   :  { %v195_v26 = vadd.f32 %v194_v60, %v51_v25  ;;  %v775_v25 = vld [vmem:[%s1121_s1 + $0x98] sm:$0xf] }
  0xc2   :  { %v214_v30 = vmax.f32 %v195_v26, 0.0  ;;  %v823_v26 = vld [vmem:[%s1121_s1 + $0xac] sm:$0xf0] }
  0xc7   :  { %v196_v61 = vpop.f32.mrf.mxu0 }
  0xc8   :  { %v197_v22 = vadd.f32 %v196_v61, %v56_v21 }
  0xca   :  { %v215_v28 = vmax.f32 %v197_v22, 0.0  ;;  %v771_v22 = vld [vmem:[%s1121_s1 + $0x68] sm:$0xf] }
  0xcc   :  { %v239_v33 = vpack.c.bf16 %v215_v28, %v214_v30 }
  0xcf   :  { %v199_v62 = vpop.f32.mrf.mxu0 }
  0xd0   :  { %v200_v19 = vadd.f32 %v199_v62, %v61_v5  ;;  %v251_v5 = vpop.permute.xlu0 %250 }
  0xd2   :  { %v216_v27 = vmax.f32 %v200_v19, 0.0  ;;  %v767_v19 = vld [vmem:[%s1121_s1 + $0x38] sm:$0xf] }
  0xd7   :  { %v201_v63 = vpop.f32.mrf.mxu0 }
  0xd8   :  { %v202_v16 = vadd.f32 %v201_v63, %v66_v15  ;;  %v261_v63 = vpop.permute.xlu1 %260  ;;  %v763_v15 = vld [vmem:[%s1121_s1 + $0x8] sm:$0xf] }
  0xda   :  { %v217_v23 = vmax.f32 %v202_v16, 0.0  ;;  %v820_v16 = vld [vmem:[%s1121_s1 + $0x1c] sm:$0xf0] }
  0xdc   :  { %v240_v29 = vpack.c.bf16 %v217_v23, %v216_v27  ;;  %v822_v23 = vld [vmem:[%s1121_s1 + $0x7c] sm:$0xf0]  ;;  %v776_v27 = vor.u32 %v823_v26, %v775_v25 }
  0xdf   :  { %v204_v0 = vpop.f32.mrf.mxu0 }
  0xe0   :  { %v205_v12 = vadd.f32 %v204_v0, %v71_v2  ;;  %v407_v35 = vpop.permute.xlu1 %406 }
  0xe2   :  { %v218_v20 = vmax.f32 %v205_v12, 0.0 }
  0xe7   :  { %v206_v1 = vpop.f32.mrf.mxu0 }
  0xe8   :  { %v207_v10 = vadd.f32 %v206_v1, %v76_v6 }
  0xea   :  { %v219_v17 = vmax.f32 %v207_v10, 0.0 }
  0xec   :  { %v241_v24 = vpack.c.bf16 %v219_v17, %v218_v20  ;;  %v821_v20 = vld [vmem:[%s1121_s1 + $0x4c] sm:$0xf0] }
  0xed   :  { %v768_v21 = vor.u32 %v821_v20, %v767_v19 }
  0xef   :  { %v209_v4 = vpop.f32.mrf.mxu0 }
  0xf0   :  { %v210_v7 = vadd.f32 %v209_v4, %v81_v3 }
  0xf2   :  { %v220_v13 = vmax.f32 %v210_v7, 0.0 }
  0xf7   :  { %v211_v9 = vpop.f32.mrf.mxu0 }
  0xf8   :  { %v212_v11 = vadd.f32 %v211_v9, %v86_v8  ;;  %v246_v9 = vpop.permute.xlu2 %245 }
  0xfa   :  { %v221_v14 = vmax.f32 %v212_v11, 0.0 }
  0xfc   :  { %v242_v18 = vpack.c.bf16 %v221_v14, %v220_v13 }
  0xfe   :  { %320 = vmatpush.bf16.msra.mxu1 %v242_v18  ;;  %v764_v18 = vor.u32 %v820_v16, %v763_v15 }
 0x102   :  { %321 = vmatpush.bf16.msra.mxu1 %v241_v24  ;;  %v772_v24 = vor.u32 %v822_v23, %v771_v22  ;;  %v799_v23 = vld [vmem:[%s1121_s1 + $0x10] sm:$0xf] }
 0x106   :  { %322 = vmatpush.bf16.msra.mxu1 %v240_v29 }
 0x10a   :  { %323 = vmatpush.bf16.msra.mxu1 %v239_v33 }
 0x10d   :  { %749 = vmatmul.msk.bf16.vlgmr.msra.gmra.mxu1 %vm303_vm1, %v736_v34  ;;  %v412_v34 = vpop.permute.xlu2 %411 }
 0x115   :  { %v387_v38 = vpop.permute.xlu2 %386 }
 0x11d   :  { %750 = vmatmul.msk.bf16.gmra.mxu1 %vm303_vm1, %v740_v37  ;;  %v397_v37 = vpop.permute.xlu0 %396 }
 0x12d   :  { %751 = vmatmul.msk.bf16.gmra.mxu1 %vm303_vm1, %v744_v40  ;;  %v402_v40 = vpop.permute.xlu1 %401 }
 0x13d   :  { %752 = vmatmul.msk.bf16.gmra.mxu1 %vm303_vm1, %v748_v43 }
 0x18a   :  { %v325_v44 = vpop.f32.mrf.mxu1 }
 0x18b   :  { %v326_v10 = vadd.f32 %v325_v44, %v246_v9 }
 0x18d   :  { %v345_v14 = vmax.f32 %v326_v10, 0.0 }
 0x192   :  { %v327_v45 = vpop.f32.mrf.mxu1 }
 0x193   :  { %v328_v6 = vadd.f32 %v327_v45, %v251_v5 }
 0x195   :  { %v346_v12 = vmax.f32 %v328_v6, 0.0 }
 0x197   :  { %v370_v17 = vpack.c.bf16 %v346_v12, %v345_v14 }
 0x19a   :  { %v330_v46 = vpop.f32.mrf.mxu1 }
 0x19b   :  { %v331_v3 = vadd.f32 %v330_v46, %v256_v54 }
 0x19d   :  { %v347_v11 = vmax.f32 %v331_v3, 0.0  ;;  %v791_v3 = vld [vmem:[%s1121_s1 + $0x3c] sm:$0xf] }
 0x1a2   :  { %v332_v47 = vpop.f32.mrf.mxu1 }
 0x1a3   :  { %v333_v0 = vadd.f32 %v332_v47, %v261_v63  ;;  %v392_v47 = vpop.permute.xlu0 %391  ;;  %v787_v63 = vld [vmem:[%s1121_s1 + $0xc] sm:$0xf] }
 0x1a5   :  { %v348_v7 = vmax.f32 %v333_v0, 0.0  ;;  %v824_v0 = vld [vmem:[%s1121_s1 + $0x20] sm:$0xf0] }
 0x1a7   :  { %v371_v13 = vpack.c.bf16 %v348_v7, %v347_v11 }
 0x1aa   :  { %v335_v48 = vpop.f32.mrf.mxu1 }
 0x1ab   :  { %v336_v60 = vadd.f32 %v335_v48, %v266_v53  ;;  %v382_v53 = vpop.permute.xlu2 %381 }
 0x1ad   :  { %v349_v4 = vmax.f32 %v336_v60, 0.0 }
 0x1b2   :  { %v337_v49 = vpop.f32.mrf.mxu1 }
 0x1b3   :  { %v338_v58 = vadd.f32 %v337_v49, %v271_v56  ;;  %v499_v16 = vpop.permute.xlu2 %498 }
 0x1b5   :  { %v350_v1 = vmax.f32 %v338_v58, 0.0 }
 0x1b7   :  { %v372_v8 = vpack.c.bf16 %v350_v1, %v349_v4  ;;  %v825_v4 = vld [vmem:[%s1121_s1 + $0x50] sm:$0xf0] }
 0x1b8   :  { %v792_v5 = vor.u32 %v825_v4, %v791_v3 }
 0x1ba   :  { %v340_v52 = vpop.f32.mrf.mxu1 }
 0x1bb   :  { %v341_v55 = vadd.f32 %v340_v52, %v276_v51 }
 0x1bd   :  { %v351_v61 = vmax.f32 %v341_v55, 0.0 }
 0x1c2   :  { %v342_v57 = vpop.f32.mrf.mxu1 }
 0x1c3   :  { %v343_v59 = vadd.f32 %v342_v57, %v281_v50  ;;  %v377_v57 = vpop.permute.xlu1 %376 }
 0x1c5   :  { %v352_v62 = vmax.f32 %v343_v59, 0.0 }
 0x1c7   :  { %v373_v2 = vpack.c.bf16 %v352_v62, %v351_v61 }
 0x1c9   :  { %450 = vmatpush.bf16.msra.mxu2 %v373_v2  ;;  %v788_v2 = vor.u32 %v824_v0, %v787_v63 }
 0x1cb   :  { %v514_v12 = vpop.permute.xlu1 %513 }
 0x1cd   :  { %451 = vmatpush.bf16.msra.mxu2 %v372_v8  ;;  %v509_v8 = vpop.permute.xlu0 %508 }
 0x1d1   :  { %452 = vmatpush.bf16.msra.mxu2 %v371_v13 }
 0x1d5   :  { %453 = vmatpush.bf16.msra.mxu2 %v370_v17  ;;  %v504_v10 = vpop.permute.xlu0 %503 }
 0x1d8   :  { %777 = vmatmul.msk.bf16.vlgmr.msra.gmra.mxu2 %vm303_vm1, %v764_v18 }
 0x1e8   :  { %778 = vmatmul.msk.bf16.gmra.mxu2 %vm303_vm1, %v768_v21 }
 0x1f8   :  { %779 = vmatmul.msk.bf16.gmra.mxu2 %vm303_vm1, %v772_v24  ;;  %v826_v24 = vld [vmem:[%s1121_s1 + $0x24] sm:$0xf0] }
 0x1f9   :  { %v800_v26 = vor.u32 %v826_v24, %v799_v23 }
 0x208   :  { %780 = vmatmul.msk.bf16.gmra.mxu2 %vm303_vm1, %v776_v27 }
 0x25b   :  { %v455_v28 = vpop.f32.mrf.mxu2 }
 0x25c   :  { %v456_v58 = vadd.f32 %v455_v28, %v377_v57  ;;  %v565_v28 = vpop.permute.xlu1 %564 }
 0x25e   :  { %v475_v62 = vmax.f32 %v456_v58, 0.0 }
 0x263   :  { %v457_v29 = vpop.f32.mrf.mxu2 }
 0x264   :  { %v458_v54 = vadd.f32 %v457_v29, %v382_v53 }
 0x266   :  { %v476_v60 = vmax.f32 %v458_v54, 0.0 }
 0x268   :  { %v492_v1 = vpack.c.bf16 %v476_v60, %v475_v62 }
 0x26b   :  { %v460_v30 = vpop.f32.mrf.mxu2 }
 0x26c   :  { %v461_v51 = vadd.f32 %v460_v30, %v387_v38  ;;  %v570_v30 = vpop.permute.xlu2 %569 }
 0x26e   :  { %v477_v59 = vmax.f32 %v461_v51, 0.0 }
 0x273   :  { %v462_v31 = vpop.f32.mrf.mxu2 }
 0x274   :  { %v463_v48 = vadd.f32 %v462_v31, %v392_v47 }
 0x276   :  { %v478_v55 = vmax.f32 %v463_v48, 0.0 }
 0x278   :  { %v493_v61 = vpack.c.bf16 %v478_v55, %v477_v59 }
 0x27b   :  { %v465_v32 = vpop.f32.mrf.mxu2 }
 0x27c   :  { %v466_v44 = vadd.f32 %v465_v32, %v397_v37  ;;  %v603_v37 = vpop.permute.xlu0 %602 }
 0x27e   :  { %v479_v52 = vmax.f32 %v466_v44, 0.0 }
 0x283   :  { %v467_v33 = vpop.f32.mrf.mxu2 }
 0x284   :  { %v468_v42 = vadd.f32 %v467_v33, %v402_v40 }
 0x286   :  { %v480_v49 = vmax.f32 %v468_v42, 0.0 }
 0x288   :  { %v494_v56 = vpack.c.bf16 %v480_v49, %v479_v52 }
 0x28b   :  { %v470_v36 = vpop.f32.mrf.mxu2 }
 0x28c   :  { %v471_v39 = vadd.f32 %v470_v36, %v407_v35  ;;  %v596_v36 = vld [vmem:[%s1121_s1 + $0x14] sm:$0x1]  ;;  %s863_s1 = smov [#allocation2]  }
 0x28d   :  { %s662_s11 = sshll.u32 %s863_s1, 4  ;;  %s663_s11 = int_to_ptr.vmem [resolvable:$true] %s662_s11 }
 0x28e   :  { %v481_v45 = vmax.f32 %v471_v39, 0.0 }
 0x293   :  { %v472_v41 = vpop.f32.mrf.mxu2 }
 0x294   :  { %v473_v43 = vadd.f32 %v472_v41, %v412_v34 }
 0x296   :  { %v482_v46 = vmax.f32 %v473_v43, 0.0 }
 0x298   :  { %v495_v50 = vpack.c.bf16 %v482_v46, %v481_v45 }
 0x29a   :  { %536 = vmatpush.bf16.msra.mxu3 %v495_v50 }
 0x29e   :  { %537 = vmatpush.bf16.msra.mxu3 %v494_v56 }
 0x2a2   :  { %538 = vmatpush.bf16.msra.mxu3 %v493_v61 }
 0x2a6   :  { %539 = vmatpush.bf16.msra.mxu3 %v492_v1 }
 0x2a9   :  { %793 = vmatmul.msk.bf16.vlgmr.msra.gmra.mxu3 %vm303_vm1, %v788_v2 }
 0x2b9   :  { %794 = vmatmul.msk.bf16.gmra.mxu3 %vm303_vm1, %v792_v5 }
 0x32c   :  { %v541_v6 = vpop.f32.mrf.mxu3 }
 0x32d   :  { %v542_v17 = vadd.f32 %v541_v6, %v499_v16 }
 0x32f   :  { %v551_v22 = vmax.f32 %v542_v17, 0.0 }
 0x334   :  { %v543_v7 = vpop.f32.mrf.mxu3 }
 0x335   :  { %v544_v14 = vadd.f32 %v543_v7, %v504_v10 }
 0x337   :  { %v552_v20 = vmax.f32 %v544_v14, 0.0 }
 0x339   :  { %v560_v25 = vpack.c.bf16 %v552_v20, %v551_v22 }
 0x33c   :  { %v546_v9 = vpop.f32.mrf.mxu3 }
 0x33d   :  { %v547_v11 = vadd.f32 %v546_v9, %v509_v8 }
 0x33f   :  { %v553_v18 = vmax.f32 %v547_v11, 0.0 }
 0x344   :  { %v548_v13 = vpop.f32.mrf.mxu3 }
 0x345   :  { %v549_v15 = vadd.f32 %v548_v13, %v514_v12 }
 0x347   :  { %v554_v19 = vmax.f32 %v549_v15, 0.0 }
 0x349   :  { %v561_v21 = vpack.c.bf16 %v554_v19, %v553_v18 }
 0x34b   :  { %586 = vmatpush.bf16.msrb.mxu3 %v561_v21 }
 0x34f   :  { %587 = vmatpush.bf16.msrb.mxu3 %v560_v25 }
 0x352   :  { %801 = vmatmul.msk.bf16.vlgmr.msrb.gmra.mxu3 %vm148_vm0, %v800_v26 }
 0x3d5   :  { %v589_v27 = vpop.f32.mrf.mxu3 }
 0x3d6   :  { %v590_v29 = vadd.f32 %v589_v27, %v565_v28 }
 0x3d8   :  { %v594_v33 = vmax.f32 %v590_v29, 0.0 }
 0x3dd   :  { %v591_v31 = vpop.f32.mrf.mxu3 }
 0x3de   :  { %v592_v32 = vadd.f32 %v591_v31, %v570_v30 }
 0x3e0   :  { %v595_v34 = vmax.f32 %v592_v32, 0.0 }
 0x3e2   :  { %v599_v35 = vpack.c.bf16 %v595_v34, %v594_v33 }
 0x3e4   :  { %616 = vmatpush.bf16.msra.mxu3 %v599_v35 }
 0x3e7   :  { %803 = vmatmul.msk.bf16.vlgmr.msra.gmra.mxu3 %vm605_vm2, %v596_v36 }
 0x46a   :  { %v618_v38 = vpop.f32.mrf.mxu3 }
 0x46b   :  { %v619_v39 = vadd.f32 %v618_v38, %v603_v37 }
 0x46d   :  { %v622_v40 = vmax.f32 %v619_v39, 0.0 }
 0x46f   :  { %v624_v41 = vsel %vm623_vm3, %v622_v40, -inf }
 0x470   :  { %v625_v42 = vrot.slane %v624_v41, 4 }
 0x472   :  { %v626_v43 = vmax.f32 %v624_v41, %v625_v42  ;;  %v620_v44 = vpop.f32.mrf.mxu3 }
 0x474   :  { %v627_v45 = vrot.slane %v626_v43, 2 }
 0x476   :  { %v628_v46 = vmax.f32 %v626_v43, %v627_v45 }
 0x478   :  { %v629_v47 = vrot.slane %v628_v46, 1 }
 0x47a   :  { %v630_v48 = vmax.f32 %v628_v46, %v629_v47 }
 0x47c   :  { %v631_v49 = vsub.f32 %v622_v40, %v630_v48 }
 0x47e   :  { %v632_v50 = vmul.f32 1.442695, %v631_v49 }
 0x480   :  { %832 = vpow2.f32 %v632_v50 }
 0x486   :  { %v833_v51 = vpop.eup %832 }
 0x487   :  { %v634_v52 = vsel %vm623_vm3, %v833_v51, 0.0 }
 0x488   :  { %v635_v53 = vrot.slane %v634_v52, 4 }
 0x48a   :  { %v636_v54 = vadd.f32 %v635_v53, %v634_v52 }
 0x48c   :  { %v637_v55 = vrot.slane %v636_v54, 2 }
 0x48e   :  { %v638_v56 = vadd.f32 %v637_v55, %v636_v54 }
 0x490   :  { %v639_v57 = vrot.slane %v638_v56, 1 }
 0x492   :  { %v640_v58 = vadd.f32 %v639_v57, %v638_v56 }
 0x494   :  { %834 = vrcp.f32 %v640_v58  ;;  %v652_v62 = vand.u32 2147483648, %v640_v58  ;;  %v650_v0 = vand.u32 2147483647, %v640_v58  ;;  %vm646_vm5 = vweird.f32 %v640_v58 }
 0x496   :  { %v653_v2 = vor.u32 1.1754944e-38, %v652_v62  ;;  %vm651_vm7 = vcmp.eq.f32.partialorder %v650_v0, 8.507059e+37 }
 0x49a   :  { %v835_v59 = vpop.eup %834 }
 0x49b   :  { %v642_v60 = vmul.f32 %v835_v59, %v640_v58  ;;  %vm647_vm4 = vweird.f32 %v835_v59 }
 0x49c   :  { %vm648_vm6 = vmor %vm646_vm5, %vm647_vm4 }
 0x49d   :  { %v643_v61 = vsub.f32 1.0, %v642_v60 }
 0x49f   :  { %v644_v63 = vmul.f32 %v835_v59, %v643_v61 }
 0x4a1   :  { %v645_v1 = vadd.f32 %v835_v59, %v644_v63 }
 0x4a3   :  { %v649_v3 = vsel %vm648_vm6, %v835_v59, %v645_v1 }
 0x4a4   :  { %v654_v4 = vsel %vm651_vm7, %v653_v2, %v649_v3 }
 0x4a5   :  { %v655_v5 = vmul.f32 %v833_v51, %v654_v4 }
 0x4a7   :  { %656 = vst [vmem:[#allocation2] sm:$0x3] %v655_v5 }
 0x4a8   :  { %667 = dma.vmem_to_hbm [thread:$0]  %s663_s11, 32, %s665_s14, [#allocation3]  }
 0x4a9   :  { %860 = dma.done.wait [#allocation3], 32  }
 0x4aa   :  { %861 = vsyncadd [#allocation3], 4294967264 }
 0x4ab   :  { %672 = vsyncpa [#allocation3], 1 }

</bundles_post_ra>
